<compile_context>
chip_gen: v6e
topology: v6e:2x2x1
jax: 0.10.0
libtpu: 0.0.40
codegen_flags: <defaults>
</compile_context>

<pallas_src>
import jax
import jax.numpy as jnp
from jax.experimental import pallas as pl
from jax.experimental.pallas import tpu as pltpu


_LANE = 128                               # TPU vreg lane width
_BLOCK_BYTES_TARGET = 8 * 1024 * 1024     # ~8 MiB/block -> 2x(in)+2x(out) = 32 MiB buffers
_VMEM_LIMIT_BYTES = 48 * 1024 * 1024      # under v7x's 64 MiB physical VMEM, ample on v5e/v6e


def _identity_kernel(x_ref, o_ref):
    # Pure pass-through copy of the current VMEM tile.
    o_ref[...] = x_ref[...]


def _sublane_multiple(itemsize):
    # Native packed tile heights: f32 -> 8, bf16 -> 16, int8/fp8 -> 32.
    return max(8, 32 // itemsize)


def _copy_2d_lane_dense(x2d):
    """Identity copy of an (M, K) lane-dense array (K % 128 == 0), ~8 MiB row tiles."""
    M, K = x2d.shape
    itemsize = jnp.dtype(x2d.dtype).itemsize
    sub = _sublane_multiple(itemsize)
    cap = max(sub, (_BLOCK_BYTES_TARGET // (K * itemsize)) // sub * sub)
    tile_m = M if M <= cap else cap        # full dim (always legal) or sublane-aligned cap
    grid = (pl.cdiv(M, tile_m),)           # partial last block handled by masked stores
    return pl.pallas_call(
        _identity_kernel,
        out_shape=jax.ShapeDtypeStruct((M, K), x2d.dtype),
        grid_spec=pltpu.PrefetchScalarGridSpec(
            num_scalar_prefetch=0,
            grid=grid,
            in_specs=[pl.BlockSpec((tile_m, K), lambda i: (i, 0))],
            out_specs=pl.BlockSpec((tile_m, K), lambda i: (i, 0)),
        ),
        cost_estimate=pl.CostEstimate(
            flops=0, transcendentals=0, bytes_accessed=2 * M * K * itemsize),
        compiler_params=pltpu.CompilerParams(
            dimension_semantics=("parallel",),   # lets v7x shard rows across 2 TCs
            vmem_limit_bytes=_VMEM_LIMIT_BYTES,
        ),
    )(x2d)


def _pick_width(total):
    """Widest lane-multiple width that exactly divides `total` (fatter unmasked rows)."""
    for w in (4096, 2048, 1024, 512, 256, 128):
        if total % w == 0:
            return w
    return None


def _identity_copy_flat(flat):
    """Identity copy of a flat 1D array through the tiled Pallas kernel."""
    total = flat.shape[0]
    w = _pick_width(total)
    if w is not None:
        # Lane-dense layout: unmasked full-lane loads/stores on every generation.
        return _copy_2d_lane_dense(flat.reshape(total // w, w)).reshape(total)
    # Lane-indivisible size: pad to a sublane*128 multiple, run the same tiled
    # path (no single-whole-block VMEM hazard), then slice the padding off.
    # TODO(synk): a manual HBM->HBM DMA variant would avoid the pad copy entirely.
    itemsize = jnp.dtype(flat.dtype).itemsize
    unit = _sublane_multiple(itemsize) * _LANE
    padded = ((total + unit - 1) // unit) * unit
    x = jnp.pad(flat, (0, padded - total))
    y = _copy_2d_lane_dense(x.reshape(padded // _LANE, _LANE))
    return y.reshape(padded)[:total]


@jax.jit
def _identity_copy(x):
    """Per-array identity copy via Pallas (one pallas_call per feature map)."""
    return _identity_copy_flat(x.reshape(-1)).reshape(x.shape)


def pallas_identity(x):
    """Identity copy of a single tensor via the Pallas kernel."""
    return _identity_copy(x)


class IdentityNoRepeatPallas:
    """JAX/Pallas equivalent of IDENTITY_NO_REPEAT.

    Identity alignment without repeating query/support to BNCHW / NBCHW.
    No learnable parameters (the PyTorch __init__ creates none).
    """

    def __init__(self, align_first=True):
        self.input_name = "_features" if align_first else "_p1"
        self.output_name = "_p1" if align_first else "_p2"

    def forward(self, features):
        query_features = list(features["query" + self.input_name])
        support_features = list(features["support" + self.input_name])
        _ = features.get("support_targets", None)  # unused, kept for parity

        # One Pallas identity copy per feature map (no concat / slice slab).
        query_out = [_identity_copy(q) for q in query_features]
        support_out = [_identity_copy(s) for s in support_features]

        features.update(
            {
                "query" + self.output_name: query_out,
                "support" + self.output_name: support_out,
            }
        )
        return features


if __name__ == "__main__":
    key = jax.random.PRNGKey(0)
    k1, k2, k3 = jax.random.split(key, 3)

    # Small shapes consistent with the module's documented conventions:
    #   query features  : B x C x H x W
    #   support features: N_support x C x H x W
    B, N_support, C, H, W = 2, 3, 4, 16, 16
    query = jax.random.normal(k1, (B, C, H, W), dtype=jnp.float32)
    support = jax.random.normal(k2, (N_support, C, H, W), dtype=jnp.float32)
    # A lane-indivisible feature map (3*4*15*15 = 2700, not a multiple of 128)
    # exercises the padded-tiled fallback path.
    support_odd = jax.random.normal(k3, (N_support, C, 15, 15), dtype=jnp.float32)

    features = {
        "query_features": [query],
        "support_features": [support, support_odd],
        "support_targets": None,  # not used by this alignment module
    }

    module = IdentityNoRepeatPallas(align_first=True)
    out = module.forward(features)

    q_out = out["query_p1"][0]
    s_out = out["support_p1"][0]
    s_odd_out = out["support_p1"][1]
    jax.block_until_ready(q_out)
    jax.block_until_ready(s_out)
    jax.block_until_ready(s_odd_out)

    # Verify identity semantics exactly.
    assert q_out.shape == query.shape and q_out.dtype == query.dtype
    assert s_out.shape == support.shape and s_out.dtype == support.dtype
    assert s_odd_out.shape == support_odd.shape and s_odd_out.dtype == support_odd.dtype
    assert bool(jnp.all(q_out == query))
    assert bool(jnp.all(s_out == support))
    assert bool(jnp.all(s_odd_out == support_odd))

    print("KERNEL_OK")
</pallas_src>

<mosaic_0001>
module attributes {stable_mosaic.version = 11 : i64} {
  func.func @_identity_kernel(%arg0: i32, %arg1: memref<1x2048xf32, #tpu.memory_space<vmem>>, %arg2: memref<1x2048xf32, #tpu.memory_space<vmem>>) attributes {dimension_semantics = [#tpu.dimension_semantics<parallel>], iteration_bounds = array<i64: 1>, scalar_prefetch = 0 : i64, scratch_operands = 0 : i64, tpu.core_type = #tpu.core_type<tc>, window_params = [{transform_indices = @transform_0, window_bounds = array<i64: 1, 2048>}, {transform_indices = @transform_1, window_bounds = array<i64: 1, 2048>}]} {
    %c0 = arith.constant 0 : index
    %c0_0 = arith.constant 0 : index
    %0 = vector.load %arg1[%c0, %c0_0] : memref<1x2048xf32, #tpu.memory_space<vmem>>, vector<1x2048xf32>
    %c0_1 = arith.constant 0 : index
    %c0_2 = arith.constant 0 : index
    %1 = vector.load %arg2[%c0_1, %c0_2] : memref<1x2048xf32, #tpu.memory_space<vmem>>, vector<1x2048xf32>
    tpu.vector_store %arg2[%c0_1, %c0_2], %0 {strides = array<i32>} : memref<1x2048xf32, #tpu.memory_space<vmem>>, vector<1x2048xf32>,
    return
  }
  func.func @transform_0(%arg0: i32) -> (i32, i32) {
    %c0_i32 = arith.constant 0 : i32
    %c0_i32_0 = arith.constant 0 : i32
    return %arg0, %c0_i32 : i32, i32
  }
  func.func @transform_1(%arg0: i32) -> (i32, i32) {
    %c0_i32 = arith.constant 0 : i32
    %c0_i32_0 = arith.constant 0 : i32
    return %arg0, %c0_i32 : i32, i32
  }
}

</mosaic_0001>

<bundles_post_ra>
// kernel: _identity_copy.1
= control target key start
LH: loop header
LB: loop body
LE: loop exit
PB: predicated region body
PF: predicated region fallthrough
CT: control target
= control target key end

     0   :  { %s38_s0 = inlined_call_operand.vmem [shape: f32[1,2048], index: 0, kind: input, shape index: {}]   ;;  %s39_s1 = inlined_call_operand.vmem [shape: f32[1,2048], index: 1, kind: output, shape index: {}]  }
   0x1   :  { %v8_v0 = vld [vmem:[%s38_s0] sm:$0xff]  ;;  %v9_v1 = vld [vmem:[%s38_s0 + $0x8] sm:$0xff] }
   0x2   :  { %10 = vst [vmem:[%s39_s1] sm:$0xff] %v8_v0  ;;  %11 = vst [vmem:[%s39_s1 + $0x8] sm:$0xff] %v9_v1 }

</bundles_post_ra>
